<compile_context>
chip_gen: v5e
topology: v5e:2x2
jax: 0.10.0
libtpu: 0.0.40
codegen_flags: <defaults>
</compile_context>

<pallas_src>
import numpy as np
import jax
import jax.numpy as jnp
from jax.experimental import pallas as pl
from jax.experimental.pallas import tpu as pltpu

# ----------------------------- configuration --------------------------------
N_FEATURES = 32
N_QUBITS = 4
Q_DEPTH = 3
NUM_CLASSES = 4
Q_DELTA = 0.01
BATCH = 8
DIM = 2 ** N_QUBITS


# --------------------- circuit constants (plain numpy glue) -----------------
def _build_circuit_constants(n_qubits):
    D = 2 ** n_qubits
    # qubit q  <->  bit position (n_qubits - 1 - q)   (qubit 0 = MSB)
    flips = np.zeros((n_qubits, D, D), np.float32)   # bit-flip permutation per qubit
    signs = np.zeros((n_qubits, D), np.float32)      # RY sign pattern per qubit
    bitsel = np.zeros((n_qubits, D), np.float32)     # bit value of qubit q in basis i
    for q in range(n_qubits):
        mask = 1 << (n_qubits - 1 - q)
        for i in range(D):
            flips[q, i, i ^ mask] = 1.0
            signs[q, i] = 1.0 if (i & mask) else -1.0
            bitsel[q, i] = 1.0 if (i & mask) else 0.0

    def cnot_mat(c, t):
        M = np.zeros((D, D), np.float32)
        cm = 1 << (n_qubits - 1 - c)
        tm = 1 << (n_qubits - 1 - t)
        for i in range(D):
            j = (i ^ tm) if (i & cm) else i
            M[j, i] = 1.0          # column-vector convention |i> -> |j>
        return M

    # one entangling layer: CNOT(i,i+1) for even i, then for odd i
    ent = np.eye(D, dtype=np.float32)
    for i in range(0, n_qubits - 1, 2):
        ent = cnot_mat(i, i + 1) @ ent
    for i in range(1, n_qubits - 1, 2):
        ent = cnot_mat(i, i + 1) @ ent
    ent_rowvec = np.ascontiguousarray(ent.T)  # psi_row @ ent_rowvec == (ent @ psi_col)^T

    # PauliZ expectation matrix: zmat[i, q] = +1 if bit q of i is 0 else -1
    zmat = np.zeros((D, n_qubits), np.float32)
    for q in range(n_qubits):
        mask = 1 << (n_qubits - 1 - q)
        for i in range(D):
            zmat[i, q] = -1.0 if (i & mask) else 1.0
    return flips, signs, ent_rowvec, zmat, bitsel


# --------------------------------- kernel ------------------------------------
def quantumnet_kernel(x_ref, wpre_ref, bpre_ref, bitsel_ref, u_ref, zw_ref,
                      bpost_ref, out_ref):
    x = x_ref[...]                                                   # (TB, F)
    # pre_net: Linear(n_features -> n_qubits)
    pre = jnp.dot(x, wpre_ref[...], preferred_element_type=jnp.float32) + bpre_ref[...]
    # q_in = tanh(pre_out) * pi / 2 ; we only ever need q_in / 2 for the RY gates
    half = jnp.tanh(pre) * np.float32(np.pi / 4.0)                   # (TB, Q)
    # batched trig: 2 EUP calls for the whole embedding layer
    ch = jnp.cos(half)
    sh = jnp.sin(half)
    inv_sqrt2 = np.float32(1.0 / np.sqrt(2.0))
    amp0 = (ch - sh) * inv_sqrt2                                     # amplitude on |0>
    amp1 = (ch + sh) * inv_sqrt2                                     # amplitude on |1>

    # H|0..0> followed by per-qubit RY is a product state:
    # psi[b, i] = prod_q amp_{bit_q(i)}[b, q]   -- pure VPU, no MXU permutations.
    bits = bitsel_ref[...]                                           # (Q, D)
    n_qubits = bits.shape[0]
    psi = None
    for q in range(n_qubits):
        b = bits[q:q + 1, :]                                         # (1, D)
        factor = amp0[:, q:q + 1] * (1.0 - b) + amp1[:, q:q + 1] * b  # (TB, D)
        psi = factor if psi is None else psi * factor

    # whole batch-independent circuit (entanglers + trainable RY layers) = one matmul
    psi = jnp.dot(psi, u_ref[...], preferred_element_type=jnp.float32)  # (TB, D)

    # PauliZ expvals folded into post_net weight:  out = (psi^2) @ (zmat @ Wpost^T) + b
    prob = psi * psi
    out_ref[...] = (jnp.dot(prob, zw_ref[...], preferred_element_type=jnp.float32)
                    + bpost_ref[...])


# -------------------------------- wrapper ------------------------------------
def _round_up(n, m):
    return ((n + m - 1) // m) * m


def quantumnet_forward(x, params, consts, tile_b=512):
    wpre_t, bpre, qp, wpost_t, bpost = params
    flips, signs, ent, zmat, bitsel = consts
    B, F = x.shape
    D = ent.shape[0]
    n_qubits = flips.shape[0]
    q_depth = qp.shape[0]
    num_classes = wpost_t.shape[1]

    # ---- fold the fixed (batch-independent) circuit into one (D, D) matrix ----
    # Built with jnp from qp inside the traced wrapper so gradients/updates to
    # q_params are not silently dropped.
    eye = jnp.eye(D, dtype=jnp.float32)
    cos_h = jnp.cos(qp * 0.5)
    sin_h = jnp.sin(qp * 0.5)
    U = eye
    for k in range(q_depth):
        U = U @ ent
        for q in range(n_qubits):
            # row-vector RY operator on qubit q: M = cos*I + sin * flip_q @ diag(sign_q)
            M = cos_h[k, q] * eye + sin_h[k, q] * (flips[q] * signs[q][None, :])
            U = U @ M
    # fold PauliZ measurement into post_net weight
    zw = zmat @ wpost_t                                             # (D, num_classes)

    # ---- batch tiling: sublane-aligned tile, batch axis parallel on the grid ----
    TB = _round_up(min(tile_b, _round_up(B, 8)), 8)
    Bp = _round_up(B, TB)
    if Bp != B:
        x = jnp.concatenate([x, jnp.zeros((Bp - B, F), x.dtype)], axis=0)
    nb = Bp // TB

    inputs = (x, wpre_t, bpre, bitsel, U, zw, bpost)
    in_specs = [
        pl.BlockSpec((TB, F), lambda i: (i, 0)),                    # x: tiled on batch
        pl.BlockSpec(wpre_t.shape, lambda i: (0, 0)),               # constants stay resident
        pl.BlockSpec(bpre.shape, lambda i: (0, 0)),
        pl.BlockSpec(bitsel.shape, lambda i: (0, 0)),
        pl.BlockSpec(U.shape, lambda i: (0, 0)),
        pl.BlockSpec(zw.shape, lambda i: (0, 0)),
        pl.BlockSpec(bpost.shape, lambda i: (0, 0)),
    ]
    out_spec = pl.BlockSpec((TB, num_classes), lambda i: (i, 0))

    out = pl.pallas_call(
        quantumnet_kernel,
        out_shape=jax.ShapeDtypeStruct((Bp, num_classes), jnp.float32),
        grid_spec=pltpu.PrefetchScalarGridSpec(
            num_scalar_prefetch=0,
            grid=(nb,),
            in_specs=in_specs,
            out_specs=out_spec,
        ),
        compiler_params=pltpu.CompilerParams(
            dimension_semantics=("parallel",)),      # lets v7x split batch over 2 TCs
    )(*inputs)
    return out[:B]


# ---------------------------------- main --------------------------------------
if __name__ == "__main__":
    key = jax.random.PRNGKey(0)
    kx, kw1, kb1, kq, kw2, kb2 = jax.random.split(key, 6)

    # deterministic synthetic inputs / parameters (PyTorch-Linear-style init)
    x = jax.random.normal(kx, (BATCH, N_FEATURES), jnp.float32)

    lim_pre = 1.0 / np.sqrt(N_FEATURES)
    w_pre = jax.random.uniform(kw1, (N_QUBITS, N_FEATURES), jnp.float32, -lim_pre, lim_pre)
    b_pre = jax.random.uniform(kb1, (1, N_QUBITS), jnp.float32, -lim_pre, lim_pre)

    q_params = Q_DELTA * jax.random.normal(kq, (Q_DEPTH, N_QUBITS), jnp.float32)

    lim_post = 1.0 / np.sqrt(N_QUBITS)
    w_post = jax.random.uniform(kw2, (NUM_CLASSES, N_QUBITS), jnp.float32, -lim_post, lim_post)
    b_post = jax.random.uniform(kb2, (1, NUM_CLASSES), jnp.float32, -lim_post, lim_post)

    params = (w_pre.T, b_pre, q_params, w_post.T, b_post)
    consts = tuple(jnp.asarray(c) for c in _build_circuit_constants(N_QUBITS))

    out = quantumnet_forward(x, params, consts)
    out = jax.block_until_ready(out)

    assert out.shape == (BATCH, NUM_CLASSES), out.shape
    assert bool(jnp.all(jnp.isfinite(out)))
    print("KERNEL_OK")
</pallas_src>

<mosaic_0001>
module attributes {stable_mosaic.version = 11 : i64} {
  func.func @quantumnet_kernel(%arg0: i32, %arg1: memref<8x32xf32, #tpu.memory_space<vmem>>, %arg2: memref<32x4xf32, #tpu.memory_space<vmem>>, %arg3: memref<1x4xf32, #tpu.memory_space<vmem>>, %arg4: memref<4x16xf32, #tpu.memory_space<vmem>>, %arg5: memref<16x16xf32, #tpu.memory_space<vmem>>, %arg6: memref<16x4xf32, #tpu.memory_space<vmem>>, %arg7: memref<1x4xf32, #tpu.memory_space<vmem>>, %arg8: memref<8x4xf32, #tpu.memory_space<vmem>>) attributes {dimension_semantics = [#tpu.dimension_semantics<parallel>], iteration_bounds = array<i64: 1>, scalar_prefetch = 0 : i64, scratch_operands = 0 : i64, tpu.core_type = #tpu.core_type<tc>, window_params = [{transform_indices = @transform_0, window_bounds = array<i64: 8, 32>}, {pipeline_mode = #tpu.pipeline_mode<synchronous>, transform_indices = @transform_1, window_bounds = array<i64: 32, 4>}, {pipeline_mode = #tpu.pipeline_mode<synchronous>, transform_indices = @transform_2, window_bounds = array<i64: 1, 4>}, {pipeline_mode = #tpu.pipeline_mode<synchronous>, transform_indices = @transform_3, window_bounds = array<i64: 4, 16>}, {pipeline_mode = #tpu.pipeline_mode<synchronous>, transform_indices = @transform_4, window_bounds = array<i64: 16, 16>}, {pipeline_mode = #tpu.pipeline_mode<synchronous>, transform_indices = @transform_5, window_bounds = array<i64: 16, 4>}, {pipeline_mode = #tpu.pipeline_mode<synchronous>, transform_indices = @transform_6, window_bounds = array<i64: 1, 4>}, {transform_indices = @transform_7, window_bounds = array<i64: 8, 4>}]} {
    %c0 = arith.constant 0 : index
    %c0_0 = arith.constant 0 : index
    %0 = vector.load %arg1[%c0, %c0_0] : memref<8x32xf32, #tpu.memory_space<vmem>>, vector<8x32xf32>
    %c0_1 = arith.constant 0 : index
    %c0_2 = arith.constant 0 : index
    %1 = vector.load %arg2[%c0_1, %c0_2] : memref<32x4xf32, #tpu.memory_space<vmem>>, vector<32x4xf32>
    %cst = arith.constant dense<0.000000e+00> : vector<8x4xf32>
    %2 = tpu.matmul %0, %1, %cst {dimension_numbers = #tpu.dot_dimension_numbers<[1], [0], [0], [1], [0, 0, 1, 1], [], []>} : vector<8x32xf32>, vector<32x4xf32>, vector<8x4xf32> -> vector<8x4xf32>
    %c0_3 = arith.constant 0 : index
    %c0_4 = arith.constant 0 : index
    %3 = vector.load %arg3[%c0_3, %c0_4] : memref<1x4xf32, #tpu.memory_space<vmem>>, vector<1x4xf32>
    %4 = vector.broadcast %3 : vector<1x4xf32> to vector<8x4xf32>
    %5 = arith.addf %2, %4 : vector<8x4xf32>
    %6 = math.tanh %5 : vector<8x4xf32>
    %cst_5 = arith.constant 0.785398185 : f32
    %7 = vector.broadcast %cst_5 : f32 to vector<8x4xf32>
    %8 = arith.mulf %6, %7 : vector<8x4xf32>
    %9 = math.cos %8 : vector<8x4xf32>
    %10 = math.sin %8 : vector<8x4xf32>
    %11 = arith.subf %9, %10 : vector<8x4xf32>
    %cst_6 = arith.constant 0.707106769 : f32
    %12 = vector.broadcast %cst_6 : f32 to vector<8x4xf32>
    %13 = arith.mulf %11, %12 : vector<8x4xf32>
    %14 = arith.addf %9, %10 : vector<8x4xf32>
    %cst_7 = arith.constant 0.707106769 : f32
    %15 = vector.broadcast %cst_7 : f32 to vector<8x4xf32>
    %16 = arith.mulf %14, %15 : vector<8x4xf32>
    %c0_8 = arith.constant 0 : index
    %c0_9 = arith.constant 0 : index
    %17 = vector.load %arg4[%c0_8, %c0_9] : memref<4x16xf32, #tpu.memory_space<vmem>>, vector<4x16xf32>
    %18 = vector.extract_strided_slice %17 {offsets = [0, 0], sizes = [1, 16], strides = [1, 1]} : vector<4x16xf32> to vector<1x16xf32>
    %19 = vector.extract_strided_slice %13 {offsets = [0, 0], sizes = [8, 1], strides = [1, 1]} : vector<8x4xf32> to vector<8x1xf32>
    %cst_10 = arith.constant 1.000000e+00 : f32
    %20 = vector.broadcast %cst_10 : f32 to vector<1x16xf32>
    %21 = arith.subf %20, %18 : vector<1x16xf32>
    %22 = vector.broadcast %19 : vector<8x1xf32> to vector<8x16xf32>
    %23 = vector.broadcast %21 : vector<1x16xf32> to vector<8x16xf32>
    %24 = arith.mulf %22, %23 : vector<8x16xf32>
    %25 = vector.extract_strided_slice %16 {offsets = [0, 0], sizes = [8, 1], strides = [1, 1]} : vector<8x4xf32> to vector<8x1xf32>
    %26 = vector.broadcast %25 : vector<8x1xf32> to vector<8x16xf32>
    %27 = vector.broadcast %18 : vector<1x16xf32> to vector<8x16xf32>
    %28 = arith.mulf %26, %27 : vector<8x16xf32>
    %29 = arith.addf %24, %28 : vector<8x16xf32>
    %30 = vector.extract_strided_slice %17 {offsets = [1, 0], sizes = [1, 16], strides = [1, 1]} : vector<4x16xf32> to vector<1x16xf32>
    %31 = vector.extract_strided_slice %13 {offsets = [0, 1], sizes = [8, 1], strides = [1, 1]} : vector<8x4xf32> to vector<8x1xf32>
    %cst_11 = arith.constant 1.000000e+00 : f32
    %32 = vector.broadcast %cst_11 : f32 to vector<1x16xf32>
    %33 = arith.subf %32, %30 : vector<1x16xf32>
    %34 = vector.broadcast %31 : vector<8x1xf32> to vector<8x16xf32>
    %35 = vector.broadcast %33 : vector<1x16xf32> to vector<8x16xf32>
    %36 = arith.mulf %34, %35 : vector<8x16xf32>
    %37 = vector.extract_strided_slice %16 {offsets = [0, 1], sizes = [8, 1], strides = [1, 1]} : vector<8x4xf32> to vector<8x1xf32>
    %38 = vector.broadcast %37 : vector<8x1xf32> to vector<8x16xf32>
    %39 = vector.broadcast %30 : vector<1x16xf32> to vector<8x16xf32>
    %40 = arith.mulf %38, %39 : vector<8x16xf32>
    %41 = arith.addf %36, %40 : vector<8x16xf32>
    %42 = arith.mulf %29, %41 : vector<8x16xf32>
    %43 = vector.extract_strided_slice %17 {offsets = [2, 0], sizes = [1, 16], strides = [1, 1]} : vector<4x16xf32> to vector<1x16xf32>
    %44 = vector.extract_strided_slice %13 {offsets = [0, 2], sizes = [8, 1], strides = [1, 1]} : vector<8x4xf32> to vector<8x1xf32>
    %cst_12 = arith.constant 1.000000e+00 : f32
    %45 = vector.broadcast %cst_12 : f32 to vector<1x16xf32>
    %46 = arith.subf %45, %43 : vector<1x16xf32>
    %47 = vector.broadcast %44 : vector<8x1xf32> to vector<8x16xf32>
    %48 = vector.broadcast %46 : vector<1x16xf32> to vector<8x16xf32>
    %49 = arith.mulf %47, %48 : vector<8x16xf32>
    %50 = vector.extract_strided_slice %16 {offsets = [0, 2], sizes = [8, 1], strides = [1, 1]} : vector<8x4xf32> to vector<8x1xf32>
    %51 = vector.broadcast %50 : vector<8x1xf32> to vector<8x16xf32>
    %52 = vector.broadcast %43 : vector<1x16xf32> to vector<8x16xf32>
    %53 = arith.mulf %51, %52 : vector<8x16xf32>
    %54 = arith.addf %49, %53 : vector<8x16xf32>
    %55 = arith.mulf %42, %54 : vector<8x16xf32>
    %56 = vector.extract_strided_slice %17 {offsets = [3, 0], sizes = [1, 16], strides = [1, 1]} : vector<4x16xf32> to vector<1x16xf32>
    %57 = vector.extract_strided_slice %13 {offsets = [0, 3], sizes = [8, 1], strides = [1, 1]} : vector<8x4xf32> to vector<8x1xf32>
    %cst_13 = arith.constant 1.000000e+00 : f32
    %58 = vector.broadcast %cst_13 : f32 to vector<1x16xf32>
    %59 = arith.subf %58, %56 : vector<1x16xf32>
    %60 = vector.broadcast %57 : vector<8x1xf32> to vector<8x16xf32>
    %61 = vector.broadcast %59 : vector<1x16xf32> to vector<8x16xf32>
    %62 = arith.mulf %60, %61 : vector<8x16xf32>
    %63 = vector.extract_strided_slice %16 {offsets = [0, 3], sizes = [8, 1], strides = [1, 1]} : vector<8x4xf32> to vector<8x1xf32>
    %64 = vector.broadcast %63 : vector<8x1xf32> to vector<8x16xf32>
    %65 = vector.broadcast %56 : vector<1x16xf32> to vector<8x16xf32>
    %66 = arith.mulf %64, %65 : vector<8x16xf32>
    %67 = arith.addf %62, %66 : vector<8x16xf32>
    %68 = arith.mulf %55, %67 : vector<8x16xf32>
    %c0_14 = arith.constant 0 : index
    %c0_15 = arith.constant 0 : index
    %69 = vector.load %arg5[%c0_14, %c0_15] : memref<16x16xf32, #tpu.memory_space<vmem>>, vector<16x16xf32>
    %cst_16 = arith.constant dense<0.000000e+00> : vector<8x16xf32>
    %70 = tpu.matmul %68, %69, %cst_16 {dimension_numbers = #tpu.dot_dimension_numbers<[1], [0], [0], [1], [0, 0, 1, 1], [], []>} : vector<8x16xf32>, vector<16x16xf32>, vector<8x16xf32> -> vector<8x16xf32>
    %71 = arith.mulf %70, %70 : vector<8x16xf32>
    %c0_17 = arith.constant 0 : index
    %c0_18 = arith.constant 0 : index
    %72 = vector.load %arg6[%c0_17, %c0_18] : memref<16x4xf32, #tpu.memory_space<vmem>>, vector<16x4xf32>
    %cst_19 = arith.constant dense<0.000000e+00> : vector<8x4xf32>
    %73 = tpu.matmul %71, %72, %cst_19 {dimension_numbers = #tpu.dot_dimension_numbers<[1], [0], [0], [1], [0, 0, 1, 1], [], []>} : vector<8x16xf32>, vector<16x4xf32>, vector<8x4xf32> -> vector<8x4xf32>
    %c0_20 = arith.constant 0 : index
    %c0_21 = arith.constant 0 : index
    %74 = vector.load %arg7[%c0_20, %c0_21] : memref<1x4xf32, #tpu.memory_space<vmem>>, vector<1x4xf32>
    %75 = vector.broadcast %74 : vector<1x4xf32> to vector<8x4xf32>
    %76 = arith.addf %73, %75 : vector<8x4xf32>
    %c0_22 = arith.constant 0 : index
    %c0_23 = arith.constant 0 : index
    %77 = vector.load %arg8[%c0_22, %c0_23] : memref<8x4xf32, #tpu.memory_space<vmem>>, vector<8x4xf32>
    tpu.vector_store %arg8[%c0_22, %c0_23], %76 {strides = array<i32>} : memref<8x4xf32, #tpu.memory_space<vmem>>, vector<8x4xf32>,
    return
  }
  func.func @transform_0(%arg0: i32) -> (i32, i32) {
    %c0_i32 = arith.constant 0 : i32
    %c0_i32_0 = arith.constant 0 : i32
    return %arg0, %c0_i32 : i32, i32
  }
  func.func @transform_1(%arg0: i32) -> (i32, i32) {
    %c0_i32 = arith.constant 0 : i32
    %c0_i32_0 = arith.constant 0 : i32
    %c0_i32_1 = arith.constant 0 : i32
    return %c0_i32, %c0_i32_0 : i32, i32
  }
  func.func @transform_2(%arg0: i32) -> (i32, i32) {
    %c0_i32 = arith.constant 0 : i32
    %c0_i32_0 = arith.constant 0 : i32
    %c0_i32_1 = arith.constant 0 : i32
    return %c0_i32, %c0_i32_0 : i32, i32
  }
  func.func @transform_3(%arg0: i32) -> (i32, i32) {
    %c0_i32 = arith.constant 0 : i32
    %c0_i32_0 = arith.constant 0 : i32
    %c0_i32_1 = arith.constant 0 : i32
    return %c0_i32, %c0_i32_0 : i32, i32
  }
  func.func @transform_4(%arg0: i32) -> (i32, i32) {
    %c0_i32 = arith.constant 0 : i32
    %c0_i32_0 = arith.constant 0 : i32
    %c0_i32_1 = arith.constant 0 : i32
    return %c0_i32, %c0_i32_0 : i32, i32
  }
  func.func @transform_5(%arg0: i32) -> (i32, i32) {
    %c0_i32 = arith.constant 0 : i32
    %c0_i32_0 = arith.constant 0 : i32
    %c0_i32_1 = arith.constant 0 : i32
    return %c0_i32, %c0_i32_0 : i32, i32
  }
  func.func @transform_6(%arg0: i32) -> (i32, i32) {
    %c0_i32 = arith.constant 0 : i32
    %c0_i32_0 = arith.constant 0 : i32
    %c0_i32_1 = arith.constant 0 : i32
    return %c0_i32, %c0_i32_0 : i32, i32
  }
  func.func @transform_7(%arg0: i32) -> (i32, i32) {
    %c0_i32 = arith.constant 0 : i32
    %c0_i32_0 = arith.constant 0 : i32
    return %arg0, %c0_i32 : i32, i32
  }
}

</mosaic_0001>

<bundles_post_ra>
// kernel: tpu_custom_call.1
= control target key start
LH: loop header
LB: loop body
LE: loop exit
PB: predicated region body
PF: predicated region fallthrough
CT: control target
= control target key end

     0   :  { %vm35_vm0 = vcmask 261120   ;;  %v523_v5 = vmov 2   ;;  %v524_v6 = vmov 1   ;;  %v525_v7 = vmov 0   ;;  %s673_s1 = inlined_call_operand.vmem [shape: f32[32,4], index: 1, kind: input, shape index: {}]   ;;  %s674_s2 = inlined_call_operand.vmem [shape: f32[1,4], index: 2, kind: input, shape index: {}]   ;;  %s675_s0 = inlined_call_operand.vmem [shape: f32[8,32], index: 0, kind: input, shape index: {}]   ;;  %s676_s4 = inlined_call_operand.vmem [shape: f32[16,16], index: 4, kind: input, shape index: {}]   ;;  %s677_s3 = inlined_call_operand.vmem [shape: f32[4,16], index: 3, kind: input, shape index: {}]   ;;  %s678_s6 = inlined_call_operand.vmem [shape: f32[1,4], index: 6, kind: input, shape index: {}]   ;;  %s679_s5 = inlined_call_operand.vmem [shape: f32[16,4], index: 5, kind: input, shape index: {}]   ;;  %s680_s7 = inlined_call_operand.vmem [shape: f32[8,4], index: 7, kind: output, shape index: {}]  }
   0x1   :  { %v30_v0 = vld [vmem:[%s673_s1 + $0x18] sm:$0xff]  ;;  %v29_v1 = vld [vmem:[%s673_s1 + $0x10] sm:$0xff]  ;;  %v28_v2 = vld [vmem:[%s673_s1 + $0x8] sm:$0xff]  ;;  %516 = vset.pattern.permute.xlu2 %v523_v5  ;;  %515 = vset.pattern.permute.xlu1 %v524_v6  ;;  %v526_v24 = vmov 683565275  }
   0x2   :  { %51 = vmatpush.msra.mxu0 %v30_v0  ;;  %v27_v3 = vld [vmem:[%s673_s1] sm:$0xff]  ;;  %514 = vset.pattern.permute.xlu0 %v525_v7  ;;  %v527_v26 = vmov 2475754826   ;;  %v528_v29 = vmov 2131351028  }
   0x3   :  { %v26_v4 = vld [vmem:[%s675_s0] sm:$0xff]  ;;  %v529_v32 = vmov 2102212464   ;;  %v530_v35 = vmov 920167782  }
   0x4   :  { %52 = vmatpush.msra.mxu0 %v29_v1  ;;  %v519_v8 = vld [vmem:[%s674_s2] ss:$0 sm:$0xff]  ;;  %v531_v38 = vmov 1326507024  }
   0x6   :  { %53 = vmatpush.msra.mxu0 %v28_v2 }
   0x8   :  { %54 = vmatpush.msra.mxu0 %v27_v3 }
   0x9   :  { %495 = vmatmul.msk.f32.vlgmr.msra.gmra.mxu0 %vm35_vm0, %v26_v4 }
  0x86   :  { %v56_v9 = vpop.f32.mrf.mxu0 }
  0x87   :  { %v57_v10 = vadd.f32 %v519_v8, %v56_v9 }
  0x89   :  { %521 = vtanh.f32 %v57_v10 }
  0x8f   :  { %v522_v11 = vpop.eup %521 }
  0x90   :  { %v592_v12 = vmul.f32 0.7853982, %v522_v11 }
  0x92   :  { %v64_v13 = vand.u32 2139095040, %v592_v12  ;;  %v61_v16 = vand.u32 2147483647, %v592_v12  ;;  %vm63_vm13 = vcmp.lt.s32.totalorder %v592_v12, 0 }
  0x94   :  { %v65_v14 = vshrl.u32 %v64_v13, 23  ;;  %v68_v18 = vand.u32 8388607, %v61_v16  ;;  %vm62_vm14 = vcmp.le.f32.partialorder %v61_v16, 0.7853982 }
  0x96   :  { %v496_v15 = vadd.s32 4294967169, %v65_v14  ;;  %v69_v22 = vor.u32 8388608, %v68_v18 }
  0x98   :  { %v71_v17 = vadd.s32 1, %v496_v15  ;;  %v608_v43 = vshll.u32 %v69_v22, 8 }
  0x9a   :  { %vm72_vm1 = vcmp.gt.s32.totalorder %v71_v17, 0  ;;  %v110_v52 = vand.u32 65535, %v608_v43  ;;  %v111_v53 = vshrl.u32 %v608_v43, 16 }
  0x9b   :  { %v73_v19 = vsel %vm72_vm1, %v71_v17, 0 }
  0x9c   :  { %v75_v20 = vand.u32 31, %v73_v19  ;;  %v600_v23 = vshrl.u32 %v73_v19, 5 }
  0x9e   :  { %v598_v21 = vsub.s32 32, %v75_v20  ;;  %v78_v25 = vshll.u32 %v526_v24, %v75_v20  ;;  %v81_v27 = vshll.u32 %v527_v26, %v75_v20  ;;  %v84_v31 = vshll.u32 %v528_v29, %v75_v20 }
  0x9f   :  { %v87_v34 = vshll.u32 %v529_v32, %v75_v20  ;;  %v90_v37 = vshll.u32 %v530_v35, %v75_v20  ;;  %vm93_vm2 = vcmp.lt.s32.totalorder %v600_v23, 1  ;;  %vm96_vm3 = vcmp.lt.s32.totalorder %v600_v23, 4 }
  0xa0   :  { %v79_v28 = vshrl.u32 %v527_v26, %v598_v21  ;;  %v82_v30 = vshrl.u32 %v528_v29, %v598_v21  ;;  %v85_v33 = vshrl.u32 %v529_v32, %v598_v21  ;;  %v88_v36 = vshrl.u32 %v530_v35, %v598_v21 }
  0xa1   :  { %v91_v39 = vshrl.u32 %v531_v38, %v598_v21  ;;  %vm95_vm4 = vcmp.lt.s32.totalorder %v600_v23, 3  ;;  %vm94_vm5 = vcmp.lt.s32.totalorder %v600_v23, 2  ;;  %v77_v19 = vshrl.u32 %v526_v24, %v598_v21 }
  0xa2   :  { %v80_v40 = vor.u32 %v79_v28, %v78_v25  ;;  %v83_v41 = vor.u32 %v82_v30, %v81_v27  ;;  %v86_v42 = vor.u32 %v85_v33, %v84_v31  ;;  %v89_v44 = vor.u32 %v88_v36, %v87_v34 }
  0xa3   :  { %v92_v45 = vor.u32 %v91_v39, %v90_v37 }
  0xa4   :  { %v101_v46 = vsel %vm93_vm2, %v80_v40, %v83_v41  ;;  %v105_v47 = vsel %vm93_vm2, %v83_v41, %v86_v42  ;;  %v102_v48 = vsel %vm96_vm3, %v89_v44, 920167782  ;;  %v98_v15 = vsel %vm96_vm3, %v86_v42, 2102212464 }
  0xa5   :  { %v106_v49 = vsel %vm96_vm3, %v92_v45, 1326507024  ;;  %v103_v50 = vsel %vm95_vm4, %v86_v42, %v102_v48  ;;  %v97_v28 = vsel %vm93_vm2, %v77_v19, %v80_v40  ;;  %v99_v29 = vsel %vm95_vm4, %v83_v41, %v98_v15 }
  0xa6   :  { %v107_v51 = vsel %vm95_vm4, %v89_v44, %v106_v49  ;;  %v104_v54 = vsel %vm94_vm5, %v101_v46, %v103_v50  ;;  %v100_v21 = vsel %vm94_vm5, %v97_v28, %v99_v29 }
  0xa7   :  { %v108_v55 = vsel %vm94_vm5, %v105_v47, %v107_v51  ;;  %v134_v58 = vand.u32 65535, %v104_v54  ;;  %v135_v59 = vshrl.u32 %v104_v54, 16  ;;  %v154_v36 = vmul.u32 %v608_v43, %v100_v21 }
  0xa8   :  { %v112_v56 = vand.u32 65535, %v108_v55  ;;  %v113_v57 = vshrl.u32 %v108_v55, 16  ;;  %vm204_vm5 = vweird.f32 %v592_v12 }
  0xa9   :  { %v137_v62 = vmul.u32 %v135_v59, %v110_v52  ;;  %v138_v63 = vmul.u32 %v134_v58, %v111_v53  ;;  %v136_v3 = vmul.u32 %v134_v58, %v110_v52  ;;  %v139_v8 = vmul.u32 %v135_v59, %v111_v53 }
  0xaa   :  { %v115_v60 = vmul.u32 %v113_v57, %v110_v52  ;;  %v116_v61 = vmul.u32 %v112_v56, %v111_v53  ;;  %v114_v0 = vmul.u32 %v112_v56, %v110_v52  ;;  %v117_v2 = vmul.u32 %v113_v57, %v111_v53 }
  0xab   :  { %v140_v4 = vshll.u32 %v137_v62, 16  ;;  %v142_v10 = vshll.u32 %v138_v63, 16  ;;  %v141_v26 = vshrl.u32 %v137_v62, 16  ;;  %v143_v32 = vshrl.u32 %v138_v63, 16 }
  0xac   :  { %v118_v1 = vshll.u32 %v115_v60, 16  ;;  %v120_v5 = vshll.u32 %v116_v61, 16  ;;  %v119_v20 = vshrl.u32 %v115_v60, 16  ;;  %v121_v30 = vshrl.u32 %v116_v61, 16 }
  0xad   :  { %vm144_vm7 = vc.u32 %v136_v3, %v140_v4  ;;  %v146_v11 = vadd.s32 %v140_v4, %v136_v3 }
  0xae   :  { %vm122_vm6 = vc.u32 %v114_v0, %v118_v1  ;;  %v124_v6 = vadd.s32 %v118_v1, %v114_v0  ;;  %v145_v14 = vsel %vm144_vm7, 1, %v525_v7  ;;  %vm489_vm7 = vcmask 31744  }
  0xaf   :  { %v123_v9 = vsel %vm122_vm6, 1, %v525_v7  ;;  %v147_v18 = vadd.s32 %v145_v14, %v139_v8  ;;  %vm148_vm9 = vc.u32 %v146_v11, %v142_v10  ;;  %v150_v35 = vadd.s32 %v146_v11, %v142_v10 }
  0xb0   :  { %v125_v13 = vadd.s32 %v123_v9, %v117_v2  ;;  %vm126_vm8 = vc.u32 %v124_v6, %v120_v5  ;;  %v149_v25 = vsel %vm148_vm9, 1, %v525_v7  ;;  %vm435_vm6 = vcmask 130048  }
  0xb1   :  { %v127_v17 = vsel %vm126_vm8, 1, %v525_v7  ;;  %v151_v27 = vadd.s32 %v149_v25, %v147_v18 }
  0xb2   :  { %v129_v22 = vadd.s32 %v127_v17, %v125_v13 }
  0xb3   :  { %v152_v33 = vadd.s32 %v151_v27, %v141_v26 }
  0xb4   :  { %v130_v31 = vadd.s32 %v129_v22, %v119_v20 }
  0xb5   :  { %v153_v24 = vadd.s32 %v152_v33, %v143_v32 }
  0xb6   :  { %v131_v34 = vadd.s32 %v130_v31, %v121_v30 }
  0xb7   :  { %v157_v7 = vadd.s32 1, %v153_v24 }
  0xb8   :  { %vm156_vm10 = vc.u32 %v131_v34, %v150_v35  ;;  %v155_v23 = vadd.s32 %v150_v35, %v131_v34 }
  0xb9   :  { %v158_v37 = vsel %vm156_vm10, %v157_v7, %v153_v24  ;;  %v532_v24 = vmov 3   ;;  %v433_v7 = vld [vmem:[%s676_s4] sm:$0xff] }
  0xba   :  { %v159_v38 = vadd.s32 %v158_v37, %v154_v36 }
  0xbc   :  { %v160_v39 = vadd.s32 536870912, %v159_v38 }
  0xbe   :  { %v161_v40 = vshrl.u32 %v160_v39, 30 }
  0xc0   :  { %v162_v42 = vshll.u32 %v161_v40, 30  ;;  %v185_v61 = vsub.s32 4, %v161_v40 }
  0xc2   :  { %v163_v41 = vsub.s32 %v159_v38, %v162_v42  ;;  %v186_v2 = vsel %vm63_vm13, %v185_v61, %v161_v40  ;;  %v374_v38 = vld [vmem:[%s677_s3] sm:$0xf] }
  0xc3   :  { %v188_v5 = vsel %vm62_vm14, 0, %v186_v2  ;;  %v375_v40 = vsub.f32 1.0, %v374_v38  ;;  %v401_v42 = vperm.slane %v374_v38, 1 }
  0xc4   :  { %vm164_vm11 = vcmp.lt.s32.totalorder %v163_v41, 0  ;;  %v165_v44 = vsub.s32 0, %v163_v41  ;;  %v359_v11 = vadd.s32 3, %v188_v5  ;;  %v205_v17 = vand.u32 3, %v188_v5  ;;  %v460_v5 = vld [vmem:[%s679_s5] sm:$0xff] }
  0xc6   :  { %v166_v45 = vsel %vm164_vm11, %v165_v44, %v163_v41  ;;  %v360_v18 = vand.u32 3, %v359_v11  ;;  %vm206_vm15 = vcmp.lt.s32.totalorder %v205_v17, 2  ;;  %vm207_vm0 = vcmp.eq.s32.totalorder %v205_v17, 0 }
  0xc7   :  { %v167_v46 = vclz %v166_v45  ;;  %vm210_vm1 = vcmp.eq.s32.totalorder %v205_v17, 2  ;;  %v395_v44 = vperm.slane %v375_v40, 1  ;;  %v381_v45 = vperm.slane %v375_v40, 0 }
  0xc8   :  { %vm361_vm2 = vcmp.lt.s32.totalorder %v360_v18, 2  ;;  %vm362_vm3 = vcmp.eq.s32.totalorder %v360_v18, 0  ;;  %vm365_vm4 = vcmp.eq.s32.totalorder %v360_v18, 2 }
  0xc9   :  { %v497_v47 = vadd.s32 4294967294, %v167_v46 }
  0xcb   :  { %vm498_vm12 = vcmp.lt.s32.totalorder %v497_v47, 0 }
  0xcc   :  { %v170_v48 = vsel %vm498_vm12, 0, %v497_v47 }
  0xcd   :  { %v171_v49 = vsub.s32 32, %v170_v48  ;;  %v175_v50 = vsub.s32 4294967266, %v170_v48  ;;  %v172_v51 = vshll.u32 %v163_v41, %v170_v48  ;;  %v388_v41 = vperm.slane %v374_v38, 0 }
  0xcf   :  { %v173_v52 = vshrl.u32 %v155_v23, %v171_v49  ;;  %v176_v53 = vadd.s32 127, %v175_v50  ;;  %v415_v49 = vperm.slane %v374_v38, 2 }
  0xd1   :  { %v174_v43 = vor.u32 %v173_v52, %v172_v51  ;;  %v177_v54 = vshll.u32 %v176_v53, 23  ;;  %v409_v53 = vperm.slane %v375_v40, 2 }
  0xd3   :  { %v178_v55 = vor.u32 4788187, %v177_v54  ;;  %v181_v56 = vcvt.s32.f32 %v174_v43 }
  0xd5   :  { %v179_v57 = vand.u32 2147483647, %v178_v55  ;;  %v429_v55 = vperm.slane %v374_v38, 3 }
  0xd7   :  { %v182_v58 = vmul.f32 %v181_v56, %v179_v57  ;;  %v423_v57 = vperm.slane %v375_v40, 3 }
  0xd9   :  { %v183_v59 = vxor.u32 2147483648, %v182_v58 }
  0xdb   :  { %v184_v60 = vsel %vm63_vm13, %v183_v59, %v182_v58 }
  0xdc   :  { %v187_v62 = vsel %vm62_vm14, %v592_v12, %v184_v60  ;;  %v434_v12 = vld [vmem:[%s676_s4 + $0x8] sm:$0xff] }
  0xdd   :  { %v189_v63 = vmul.f32 %v187_v62, %v187_v62  ;;  %453 = vmatpush.msra.mxu1 %v434_v12 }
  0xdf   :  { %v190_v0 = vmul.f32 -0.001358992, %v189_v63  ;;  %v197_v1 = vmul.f32 -0.00019511016, %v189_v63  ;;  %454 = vmatpush.msra.mxu1 %v433_v7 }
  0xe1   :  { %v191_v3 = vadd.f32 0.041655596, %v190_v0  ;;  %v198_v4 = vadd.f32 0.008332121, %v197_v1 }
  0xe3   :  { %v192_v6 = vmul.f32 %v191_v3, %v189_v63  ;;  %v199_v8 = vmul.f32 %v198_v4, %v189_v63  ;;  %v461_v4 = vld [vmem:[%s679_s5 + $0x8] sm:$0xff] }
  0xe4   :  { %483 = vmatpush.msra.mxu2 %v461_v4 }
  0xe5   :  { %v193_v9 = vadd.f32 -0.4999988, %v192_v6  ;;  %v200_v10 = vadd.f32 -0.16666654, %v199_v8 }
  0xe6   :  { %484 = vmatpush.msra.mxu2 %v460_v5 }
  0xe7   :  { %v194_v13 = vmul.f32 %v193_v9, %v189_v63  ;;  %v201_v14 = vmul.f32 %v200_v10, %v189_v63  ;;  %v520_v9 = vld [vmem:[%s678_s6] ss:$0 sm:$0xff] }
  0xe9   :  { %v195_v15 = vadd.f32 1.0, %v194_v13  ;;  %v202_v16 = vadd.f32 1.0, %v201_v14 }
  0xeb   :  { %v203_v19 = vmul.f32 %v202_v16, %v187_v62  ;;  %v211_v20 = vxor.u32 2147483648, %v195_v15 }
  0xed   :  { %v208_v22 = vxor.u32 2147483648, %v203_v19  ;;  %v212_v26 = vsel %vm210_vm1, %v211_v20, %v203_v19  ;;  %v367_v28 = vsel %vm365_vm4, %v211_v20, %v203_v19 }
  0xef   :  { %v209_v25 = vsel %vm207_vm0, %v195_v15, %v208_v22  ;;  %v364_v27 = vsel %vm362_vm3, %v195_v15, %v208_v22 }
  0xf0   :  { %v213_v29 = vsel %vm206_vm15, %v209_v25, %v212_v26  ;;  %v368_v30 = vsel %vm361_vm2, %v364_v27, %v367_v28 }
  0xf1   :  { %v214_v31 = vsel %vm204_vm5, nan, %v213_v29  ;;  %v369_v32 = vsel %vm204_vm5, nan, %v368_v30 }
  0xf2   :  { %v370_v33 = vsub.f32 %v214_v31, %v369_v32  ;;  %v372_v35 = vadd.f32 %v369_v32, %v214_v31 }
  0xf4   :  { %v371_v34 = vmul.f32 0.70710677, %v370_v33  ;;  %v373_v21 = vmul.f32 0.70710677, %v372_v35 }
  0xf6   :  { %406 = vperm.xlu2 %516, %v371_v34   ;;  %392 = vperm.xlu1 %515, %v371_v34  }
  0xf7   :  { %378 = vperm.xlu0 %514, %v371_v34  }
  0xfe   :  { %412 = vperm.xlu2 %516, %v373_v21   ;;  %398 = vperm.xlu1 %515, %v373_v21  }
  0xff   :  { %385 = vperm.xlu0 %514, %v373_v21  }
 0x106   :  { %518 = vset.pattern.permute.xlu1 %v532_v24 }
 0x107   :  { %517 = vset.pattern.permute.xlu0 %v532_v24  ;;  %426 = vperm.xlu1 %518, %v373_v21  }
 0x108   :  { %420 = vperm.xlu0 %517, %v371_v34  }
 0x150   :  { %v407_v39 = vpop.permute.xlu2 %406 }
 0x151   :  { %v410_v58 = vmul.f32 %v409_v53, %v407_v39 }
 0x158   :  { %v413_v52 = vpop.permute.xlu2 %412 }
 0x159   :  { %v416_v56 = vmul.f32 %v415_v49, %v413_v52 }
 0x15b   :  { %v417_v63 = vadd.f32 %v416_v56, %v410_v58 }
 0x168   :  { %v393_v36 = vpop.permute.xlu1 %392 }
 0x169   :  { %v379_v37 = vpop.permute.xlu0 %378  ;;  %v396_v50 = vmul.f32 %v395_v44, %v393_v36 }
 0x16a   :  { %v382_v51 = vmul.f32 %v381_v45, %v379_v37 }
 0x170   :  { %v399_v46 = vpop.permute.xlu1 %398 }
 0x171   :  { %v402_v47 = vmul.f32 %v401_v42, %v399_v46  ;;  %v386_v48 = vpop.permute.xlu0 %385 }
 0x172   :  { %v389_v23 = vmul.f32 %v388_v41, %v386_v48 }
 0x173   :  { %v403_v43 = vadd.f32 %v402_v47, %v396_v50 }
 0x174   :  { %v390_v54 = vadd.f32 %v389_v23, %v382_v51 }
 0x176   :  { %v404_v59 = vmul.f32 %v403_v43, %v390_v54 }
 0x178   :  { %v418_v2 = vmul.f32 %v417_v63, %v404_v59 }
 0x179   :  { %v427_v60 = vpop.permute.xlu1 %426 }
 0x17a   :  { %v430_v61 = vmul.f32 %v429_v55, %v427_v60  ;;  %v421_v62 = vpop.permute.xlu0 %420 }
 0x17b   :  { %v424_v0 = vmul.f32 %v423_v57, %v421_v62 }
 0x17d   :  { %v431_v1 = vadd.f32 %v430_v61, %v424_v0 }
 0x17f   :  { %v432_v3 = vmul.f32 %v431_v1, %v418_v2 }
 0x181   :  { %502 = vmatmul.msk.f32.vlgmr.msra.gmra.mxu1 %vm435_vm6, %v432_v3 }
 0x1fe   :  { %v456_v6 = vpop.f32.mrf.mxu1 }
 0x1ff   :  { %v459_v8 = vmul.f32 %v456_v6, %v456_v6 }
 0x201   :  { %503 = vmatmul.msk.f32.vlgmr.msra.gmra.mxu2 %vm435_vm6, %v459_v8 }
 0x284   :  { %v486_v10 = vpop.f32.mrf.mxu2 }
 0x285   :  { %v487_v11 = vadd.f32 %v520_v9, %v486_v10 }
 0x287   :  { %490 = vst.msk [vmem:[%s680_s7] sm:$0xff] %vm489_vm7, %v487_v11 }

</bundles_post_ra>
